<compile_context>
chip_gen: v7x
topology: tpu7x:2x2x1
jax: 0.10.0
libtpu: 0.0.40
codegen_flags: <defaults>
</compile_context>

<pallas_src>
import functools

import jax
import jax.numpy as jnp
from jax import lax
from jax.experimental import pallas as pl
from jax.experimental.pallas import tpu as pltpu


# ---------------------------------------------------------------------------
# Shared math — used verbatim by both the Pallas kernels and the pure-JAX
# reference, so the self-test validates the Pallas plumbing tightly.
# ---------------------------------------------------------------------------

def _layernorm(x, gamma, beta, eps=1e-5):
    mu = jnp.mean(x, axis=-1, keepdims=True)
    xc = x - mu
    var = jnp.mean(xc * xc, axis=-1, keepdims=True)
    return xc * lax.rsqrt(var + eps) * gamma + beta


def _embed_math(x_sd, we, be, pos_sh):
    # x_sd: [S, Din] bf16, we: [Din, H] bf16, be/pos_sh: f32 -> [S, H] f32
    return jnp.dot(x_sd, we, preferred_element_type=jnp.float32) + be + pos_sh


def _encoder_layer_math(x, *, wqkv, bqkv, wo, bo, ln1g, ln1b,
                        w1, b1, w2, b2, ln2g, ln2b, num_heads):
    """Post-LN TransformerEncoderLayer (relu FFN, eval mode). x: [S, H] f32."""
    S, H = x.shape
    dh = H // num_heads
    scale = 1.0 / (dh ** 0.5)
    cdt = wqkv.dtype  # bf16 operands -> MXU fast path; accumulate f32

    qkv = jnp.dot(x.astype(cdt), wqkv, preferred_element_type=jnp.float32) + bqkv
    q, k, v = qkv[:, :H], qkv[:, H:2 * H], qkv[:, 2 * H:]

    attn = None
    for hh in range(num_heads):
        sl = slice(hh * dh, (hh + 1) * dh)
        qh, kh, vh = q[:, sl], k[:, sl], v[:, sl]
        logits = jnp.einsum("sd,td->st", qh.astype(cdt), kh.astype(cdt),
                            preferred_element_type=jnp.float32) * scale
        logits = logits - jnp.max(logits, axis=-1, keepdims=True)
        p = jnp.exp(logits)                                   # f32 softmax
        p = p / jnp.sum(p, axis=-1, keepdims=True)
        ctx = jnp.dot(p.astype(cdt), vh.astype(cdt),
                      preferred_element_type=jnp.float32)     # [S, dh]
        # concat(ctx_h) @ Wo  ==  sum_h  ctx_h @ Wo[h*dh:(h+1)*dh, :]
        contrib = jnp.dot(ctx.astype(cdt), wo[sl, :],
                          preferred_element_type=jnp.float32)  # [S, H]
        attn = contrib if attn is None else attn + contrib
    attn = attn + bo

    y = _layernorm(x + attn, ln1g, ln1b)                       # residual + LN1

    f = jnp.dot(y.astype(cdt), w1, preferred_element_type=jnp.float32) + b1
    f = jnp.maximum(f, 0.0)                                    # relu FFN
    f = jnp.dot(f.astype(cdt), w2, preferred_element_type=jnp.float32) + b2
    return _layernorm(y + f, ln2g, ln2b)                       # residual + LN2


def _head_math(x_sh, wf, bf):
    pooled = jnp.mean(x_sh, axis=0, keepdims=True)             # [1, H] f32
    return jnp.dot(pooled.astype(wf.dtype), wf,
                   preferred_element_type=jnp.float32) + bf    # [1, O_pad] f32


# ---------------------------------------------------------------------------
# Pallas kernels (grid = batch axis; one batch element per step)
# ---------------------------------------------------------------------------

def _embed_kernel(x_ref, we_ref, be_ref, pos_ref, o_ref):
    h = _embed_math(x_ref[0], we_ref[...], be_ref[...], pos_ref[0])
    o_ref[0] = h.astype(o_ref.dtype)


def _encoder_layer_kernel(x_ref, wqkv_ref, bqkv_ref, wo_ref, bo_ref,
                          ln1g_ref, ln1b_ref, w1_ref, b1_ref, w2_ref, b2_ref,
                          ln2g_ref, ln2b_ref, o_ref, *, num_heads):
    y = _encoder_layer_math(
        x_ref[0].astype(jnp.float32),
        wqkv=wqkv_ref[...], bqkv=bqkv_ref[...], wo=wo_ref[...], bo=bo_ref[...],
        ln1g=ln1g_ref[...], ln1b=ln1b_ref[...],
        w1=w1_ref[...], b1=b1_ref[...], w2=w2_ref[...], b2=b2_ref[...],
        ln2g=ln2g_ref[...], ln2b=ln2b_ref[...], num_heads=num_heads)
    o_ref[0] = y.astype(o_ref.dtype)


def _head_kernel(x_ref, wf_ref, bf_ref, o_ref):
    out = _head_math(x_ref[0].astype(jnp.float32), wf_ref[...], bf_ref[...])
    o_ref[0] = out.astype(o_ref.dtype)


# ---------------------------------------------------------------------------
# Wrapper
# ---------------------------------------------------------------------------

def _nbytes(*arrays):
    return int(sum(int(a.size) * a.dtype.itemsize for a in arrays))


def _compiler_params(bytes_accessed):
    # Weights resident + double-buffered activation tiles + headroom, capped at
    # v7x's 64 MiB physical VMEM (v5e/v6e have 128 MiB, so this is always safe).
    limit = int(min(64 * 1024 * 1024, max(16 * 1024 * 1024, 4 * int(bytes_accessed))))
    return pltpu.CompilerParams(
        dimension_semantics=("parallel",),      # batch axis -> megacore split on v7x
        vmem_limit_bytes=limit,
    )


def _cast_params(params, o_pad):
    """bf16 matmul weights, f32 biases/LN/pos; classifier weights padded lane-dense."""
    bf16 = jnp.bfloat16
    H, O = params["wf"].shape
    wf = jnp.zeros((H, o_pad), jnp.float32).at[:, :O].set(params["wf"]).astype(bf16)
    bf = jnp.zeros((1, o_pad), jnp.float32).at[:, :O].set(params["bf"])
    layers = []
    for lp in params["layers"]:
        layers.append(dict(
            wqkv=lp["wqkv"].astype(bf16), bqkv=lp["bqkv"],
            wo=lp["wo"].astype(bf16), bo=lp["bo"],
            ln1g=lp["ln1g"], ln1b=lp["ln1b"],
            w1=lp["w1"].astype(bf16), b1=lp["b1"],
            w2=lp["w2"].astype(bf16), b2=lp["b2"],
            ln2g=lp["ln2g"], ln2b=lp["ln2b"],
        ))
    return dict(we=params["we"].astype(bf16), be=params["be"], pos=params["pos"],
                wf=wf, bf=bf, layers=layers)


def transformer_classifier_forward(x, params, *, num_heads):
    """x: [B, num_points, input_dim] float32. params from init_params()."""
    B, S, Din = x.shape
    H = params["we"].shape[1]
    O = params["wf"].shape[1]
    assert S <= params["pos"].shape[1], "num_points exceeds max_points"
    assert H % num_heads == 0

    # Lane-dense classifier output (pad O up to a multiple of 128, slice back).
    O_pad = int(pl.cdiv(max(O, 128), 128)) * 128

    cp = _cast_params(params, O_pad)
    xb = x.astype(jnp.bfloat16)
    pos_s = cp["pos"][:, :S, :]

    batch_map3 = lambda b: (b, 0, 0)
    rep2 = lambda b: (0, 0)
    rep3 = lambda b: (0, 0, 0)

    # ----------------------- embedding + positional encoding -----------------------
    bytes_embed = _nbytes(xb, cp["we"], cp["be"], pos_s) + B * S * H * 2
    h = pl.pallas_call(
        _embed_kernel,
        out_shape=jax.ShapeDtypeStruct((B, S, H), jnp.bfloat16),
        grid_spec=pltpu.PrefetchScalarGridSpec(
            num_scalar_prefetch=0,
            grid=(B,),
            in_specs=[
                pl.BlockSpec((1, S, Din), batch_map3),   # x tile (per batch element)
                pl.BlockSpec((Din, H), rep2),            # W_embed (constant index -> fetched once)
                pl.BlockSpec((1, H), rep2),              # b_embed
                pl.BlockSpec((1, S, H), rep3),           # positional encoding (sliced to S)
            ],
            out_specs=pl.BlockSpec((1, S, H), batch_map3),
        ),
        compiler_params=_compiler_params(bytes_embed),
        cost_estimate=pl.CostEstimate(flops=int(2 * B * S * Din * H),
                                      transcendentals=0,
                                      bytes_accessed=int(bytes_embed)),
    )(xb, cp["we"], cp["be"], pos_s)

    # --------------------------------- encoder layers -------------------------------
    layer_kernel = functools.partial(_encoder_layer_kernel, num_heads=num_heads)
    flops_layer = int(B * S * H * (24 * H + 4 * S))
    trans_layer = int(B * (num_heads * S * S + 2 * S))
    for lp in cp["layers"]:
        w_args = (lp["wqkv"], lp["bqkv"], lp["wo"], lp["bo"], lp["ln1g"], lp["ln1b"],
                  lp["w1"], lp["b1"], lp["w2"], lp["b2"], lp["ln2g"], lp["ln2b"])
        bytes_layer = _nbytes(h, *w_args) + B * S * H * 2
        h = pl.pallas_call(
            layer_kernel,
            out_shape=jax.ShapeDtypeStruct((B, S, H), jnp.bfloat16),
            grid_spec=pltpu.PrefetchScalarGridSpec(
                num_scalar_prefetch=0,
                grid=(B,),
                in_specs=[
                    pl.BlockSpec((1, S, H), batch_map3),     # activations
                    # Constant index_maps below: weight blocks are DMA'd once and
                    # stay VMEM-resident across the batch grid.
                    pl.BlockSpec((H, 3 * H), rep2),          # W_qkv   ([in, out] layout)
                    pl.BlockSpec((1, 3 * H), rep2),          # b_qkv
                    pl.BlockSpec((H, H), rep2),              # W_out_proj
                    pl.BlockSpec((1, H), rep2),              # b_out_proj
                    pl.BlockSpec((1, H), rep2),              # LN1 gamma
                    pl.BlockSpec((1, H), rep2),              # LN1 beta
                    pl.BlockSpec((H, 4 * H), rep2),          # W_ffn1
                    pl.BlockSpec((1, 4 * H), rep2),          # b_ffn1
                    pl.BlockSpec((4 * H, H), rep2),          # W_ffn2
                    pl.BlockSpec((1, H), rep2),              # b_ffn2
                    pl.BlockSpec((1, H), rep2),              # LN2 gamma
                    pl.BlockSpec((1, H), rep2),              # LN2 beta
                ],
                out_specs=pl.BlockSpec((1, S, H), batch_map3),
            ),
            compiler_params=_compiler_params(bytes_layer),
            cost_estimate=pl.CostEstimate(flops=flops_layer,
                                          transcendentals=trans_layer,
                                          bytes_accessed=int(bytes_layer)),
        )(h, *w_args)

    # ----------------------------- mean-pool + classifier ---------------------------
    bytes_head = _nbytes(h, cp["wf"], cp["bf"]) + B * O_pad * 4
    out = pl.pallas_call(
        _head_kernel,
        out_shape=jax.ShapeDtypeStruct((B, 1, O_pad), jnp.float32),
        grid_spec=pltpu.PrefetchScalarGridSpec(
            num_scalar_prefetch=0,
            grid=(B,),
            in_specs=[
                pl.BlockSpec((1, S, H), batch_map3),
                pl.BlockSpec((H, O_pad), rep2),              # W_fc, padded lane-dense
                pl.BlockSpec((1, O_pad), rep2),              # b_fc, padded lane-dense
            ],
            out_specs=pl.BlockSpec((1, 1, O_pad), batch_map3),
        ),
        compiler_params=_compiler_params(bytes_head),
        cost_estimate=pl.CostEstimate(flops=int(2 * B * H * O_pad + B * S * H),
                                      transcendentals=0,
                                      bytes_accessed=int(bytes_head)),
    )(h, cp["wf"], cp["bf"])
    return out[:, 0, :O]


# ---------------------------------------------------------------------------
# Parameter init (deterministic, torch-Linear-style uniform) and JAX reference
# ---------------------------------------------------------------------------

def init_params(key, input_dim, num_heads, num_layers, hidden_dim, output_dim,
                max_points, dtype=jnp.float32):
    assert hidden_dim % num_heads == 0
    ks = iter(jax.random.split(key, 8 + 8 * num_layers))

    def lin(fan_in, fan_out):
        bound = 1.0 / (fan_in ** 0.5)
        w = jax.random.uniform(next(ks), (fan_in, fan_out), dtype, -bound, bound)
        b = jax.random.uniform(next(ks), (1, fan_out), dtype, -bound, bound)
        return w, b

    we, be = lin(input_dim, hidden_dim)
    pos = jax.random.normal(next(ks), (1, max_points, hidden_dim), dtype)
    layers = []
    for _ in range(num_layers):
        wqkv, bqkv = lin(hidden_dim, 3 * hidden_dim)
        wo, bo = lin(hidden_dim, hidden_dim)
        w1, b1 = lin(hidden_dim, 4 * hidden_dim)
        w2, b2 = lin(4 * hidden_dim, hidden_dim)
        layers.append(dict(
            wqkv=wqkv, bqkv=bqkv, wo=wo, bo=bo,
            ln1g=jnp.ones((1, hidden_dim), dtype), ln1b=jnp.zeros((1, hidden_dim), dtype),
            w1=w1, b1=b1, w2=w2, b2=b2,
            ln2g=jnp.ones((1, hidden_dim), dtype), ln2b=jnp.zeros((1, hidden_dim), dtype),
        ))
    wf, bf = lin(hidden_dim, output_dim)
    return dict(we=we, be=be, pos=pos, layers=layers, wf=wf, bf=bf)


def _reference_forward(x, params, *, num_heads):
    """Pure-JAX forward using the exact same math/casts as the Pallas kernels."""
    B, S, _ = x.shape
    O = params["wf"].shape[1]
    O_pad = int(pl.cdiv(max(O, 128), 128)) * 128
    cp = _cast_params(params, O_pad)
    pos_s = cp["pos"][:, :S, :]

    h = jax.vmap(lambda xs: _embed_math(xs, cp["we"], cp["be"], pos_s[0]))(
        x.astype(jnp.bfloat16)).astype(jnp.bfloat16)
    for lp in cp["layers"]:
        h = jax.vmap(lambda xs, lp=lp: _encoder_layer_math(
            xs.astype(jnp.float32), num_heads=num_heads, **lp))(h).astype(jnp.bfloat16)
    out = jax.vmap(lambda xs: _head_math(xs.astype(jnp.float32), cp["wf"], cp["bf"]))(h)
    return out[:, 0, :O]


if __name__ == "__main__":
    key = jax.random.PRNGKey(0)
    k_x, k_p = jax.random.split(key)

    # Small shapes consistent with the module: x = [batch, num_points, input_dim].
    B, S, Din = 2, 8, 8
    num_heads, num_layers = 4, 2
    hidden_dim, output_dim, max_points = 32, 10, 16

    x = jax.random.normal(k_x, (B, S, Din), jnp.float32)
    params = init_params(k_p, Din, num_heads, num_layers, hidden_dim, output_dim, max_points)

    out = transformer_classifier_forward(x, params, num_heads=num_heads)
    out = jax.block_until_ready(out)

    ref = _reference_forward(x, params, num_heads=num_heads)
    assert out.shape == (B, output_dim), out.shape
    assert jnp.allclose(out, ref, atol=2e-2, rtol=2e-2), "mismatch vs reference"

    print("KERNEL_OK")
</pallas_src>

<mosaic_0001>
module attributes {stable_mosaic.version = 11 : i64} {
  func.func @_embed_kernel(%arg0: i32, %arg1: memref<1x8x8xbf16, #tpu.memory_space<vmem>>, %arg2: memref<8x32xbf16, #tpu.memory_space<vmem>>, %arg3: memref<1x32xf32, #tpu.memory_space<vmem>>, %arg4: memref<1x8x32xf32, #tpu.memory_space<vmem>>, %arg5: memref<1x8x32xbf16, #tpu.memory_space<vmem>>) attributes {dimension_semantics = [#tpu.dimension_semantics<parallel>], iteration_bounds = array<i64: 2>, scalar_prefetch = 0 : i64, scratch_operands = 0 : i64, tpu.core_type = #tpu.core_type<tc>, window_params = [{transform_indices = @transform_0, window_bounds = array<i64: 1, 8, 8>}, {pipeline_mode = #tpu.pipeline_mode<synchronous>, transform_indices = @transform_1, window_bounds = array<i64: 8, 32>}, {pipeline_mode = #tpu.pipeline_mode<synchronous>, transform_indices = @transform_2, window_bounds = array<i64: 1, 32>}, {pipeline_mode = #tpu.pipeline_mode<synchronous>, transform_indices = @transform_3, window_bounds = array<i64: 1, 8, 32>}, {transform_indices = @transform_4, window_bounds = array<i64: 1, 8, 32>}]} {
    %c0 = arith.constant 0 : index
    %c0_0 = arith.constant 0 : index
    %c0_1 = arith.constant 0 : index
    %0 = vector.load %arg1[%c0, %c0_0, %c0_1] : memref<1x8x8xbf16, #tpu.memory_space<vmem>>, vector<1x8x8xbf16>
    %1 = vector.shape_cast %0 : vector<1x8x8xbf16> to vector<8x8xbf16>
    %c0_2 = arith.constant 0 : index
    %c0_3 = arith.constant 0 : index
    %2 = vector.load %arg2[%c0_2, %c0_3] : memref<8x32xbf16, #tpu.memory_space<vmem>>, vector<8x32xbf16>
    %c0_4 = arith.constant 0 : index
    %c0_5 = arith.constant 0 : index
    %3 = vector.load %arg3[%c0_4, %c0_5] : memref<1x32xf32, #tpu.memory_space<vmem>>, vector<1x32xf32>
    %c0_6 = arith.constant 0 : index
    %c0_7 = arith.constant 0 : index
    %c0_8 = arith.constant 0 : index
    %4 = vector.load %arg4[%c0_6, %c0_7, %c0_8] : memref<1x8x32xf32, #tpu.memory_space<vmem>>, vector<1x8x32xf32>
    %5 = vector.shape_cast %4 : vector<1x8x32xf32> to vector<8x32xf32>
    %cst = arith.constant dense<0.000000e+00> : vector<8x32xf32>
    %6 = tpu.matmul %1, %2, %cst {dimension_numbers = #tpu.dot_dimension_numbers<[1], [0], [0], [1], [0, 0, 1, 1], [], []>} : vector<8x8xbf16>, vector<8x32xbf16>, vector<8x32xf32> -> vector<8x32xf32>
    %7 = vector.broadcast %3 : vector<1x32xf32> to vector<8x32xf32>
    %8 = arith.addf %6, %7 : vector<8x32xf32>
    %9 = arith.addf %8, %5 : vector<8x32xf32>
    %10 = arith.truncf %9 : vector<8x32xf32> to vector<8x32xbf16>
    %c0_9 = arith.constant 0 : index
    %c0_10 = arith.constant 0 : index
    %c0_11 = arith.constant 0 : index
    %11 = vector.load %arg5[%c0_9, %c0_10, %c0_11] : memref<1x8x32xbf16, #tpu.memory_space<vmem>>, vector<1x8x32xbf16>
    %12 = vector.shape_cast %11 : vector<1x8x32xbf16> to vector<8x32xbf16>
    %13 = vector.shape_cast %10 : vector<8x32xbf16> to vector<1x8x32xbf16>
    tpu.vector_store %arg5[%c0_9, %c0_10, %c0_11], %13 {strides = array<i32>} : memref<1x8x32xbf16, #tpu.memory_space<vmem>>, vector<1x8x32xbf16>,
    return
  }
  func.func @transform_0(%arg0: i32) -> (i32, i32, i32) {
    %c0_i32 = arith.constant 0 : i32
    %c0_i32_0 = arith.constant 0 : i32
    %c0_i32_1 = arith.constant 0 : i32
    return %arg0, %c0_i32, %c0_i32_0 : i32, i32, i32
  }
  func.func @transform_1(%arg0: i32) -> (i32, i32) {
    %c0_i32 = arith.constant 0 : i32
    %c0_i32_0 = arith.constant 0 : i32
    %c0_i32_1 = arith.constant 0 : i32
    return %c0_i32, %c0_i32_0 : i32, i32
  }
  func.func @transform_2(%arg0: i32) -> (i32, i32) {
    %c0_i32 = arith.constant 0 : i32
    %c0_i32_0 = arith.constant 0 : i32
    %c0_i32_1 = arith.constant 0 : i32
    return %c0_i32, %c0_i32_0 : i32, i32
  }
  func.func @transform_3(%arg0: i32) -> (i32, i32, i32) {
    %c0_i32 = arith.constant 0 : i32
    %c0_i32_0 = arith.constant 0 : i32
    %c0_i32_1 = arith.constant 0 : i32
    %c0_i32_2 = arith.constant 0 : i32
    return %c0_i32, %c0_i32_0, %c0_i32_1 : i32, i32, i32
  }
  func.func @transform_4(%arg0: i32) -> (i32, i32, i32) {
    %c0_i32 = arith.constant 0 : i32
    %c0_i32_0 = arith.constant 0 : i32
    %c0_i32_1 = arith.constant 0 : i32
    return %arg0, %c0_i32, %c0_i32_0 : i32, i32, i32
  }
}

</mosaic_0001>

<bundles_post_ra>
// kernel: tpu_custom_call.1
= control target key start
LH: loop header
LB: loop body
LE: loop exit
PB: predicated region body
PF: predicated region fallthrough
CT: control target
= control target key end

     0   :  { %9 = vsyncpa [#allocation3], 0  ;;  %s833_s0 = inlined_call_operand.hbm [shape: bf16[2,8,8], index: 0, kind: input, shape index: {}]   ;;  %s834_s1 = inlined_call_operand.hbm [shape: bf16[8,32], index: 1, kind: input, shape index: {}]   ;;  %s835_s2 = inlined_call_operand.vmem [shape: f32[1,32], index: 2, kind: input, shape index: {}]   ;;  %s836_s3 = inlined_call_operand.vmem [shape: f32[1,8,32], index: 3, kind: input, shape index: {}]   ;;  %s837_s4 = inlined_call_operand.hbm [shape: bf16[2,8,32], index: 4, kind: output, shape index: {}]  }
   0x1   :  { %11 = vsyncpa [#allocation3 + $0x1], 0 }
   0x2   :  { %12 = vsyncpa [#allocation6], 0 }
   0x3   :  { %13 = vsyncpa [#allocation4], 0 }
   0x4   :  { %15 = vsyncpa [#allocation4 + $0x1], 0  ;;  %s626_s15 = smov 0   ;;  %s628_s16 = smov 0  }
   0x5   :  { %s630_s17 = smov 0   ;;  %s632_s18 = smov 0  }
   0x6 LB: > { %s647_s19 = sadd.s32 4294967295, %s594_s18   ;;  %s383_s20 = sadd.s32 4294967294, %s594_s18   ;;  %s594_s18 = sphi %s632_s18, %s861_s18   ;;  %s590_s17 = sphi %s630_s17, %s860_s17   ;;  %s586_s16 = sphi %s628_s16, %s859_s16   ;;  %s582_s15 = sphi %s626_s15, %s858_s15  }
   0x7   : > { %p41_p0 = scmp.ne.s32.totalorder %s586_s16, %s582_s15  ;;  %p838_p1 = scmp.eq.s32.totalorder %s647_s19, 0 }
   0x8   : > { %p134_p3 = scmp.eq.s32.totalorder %s383_s20, 1  ;;  %p384_p5 = scmp.ge.s32.totalorder %s594_s18, 1 }
   0x9   : > { %p656_p4 = por %p838_p1, %p41_p0  ;;  %p141_p7 = scmp.lt.s32.totalorder %s594_s18, 3 }
   0xa   : > { %p661_p6 = por %p134_p3, %p41_p0  ;;  %s596_s24 = smov [#allocation5]  }
   0xb   : > { %s841_s21 = scalar_select %p656_p4, 1, 0 }
   0xc   : > { %s842_s22 = scalar_select %p661_p6, 1, 0 }
   0xd   : > { %p666_p8 = pnand %p384_p5, %p141_p7  ;;  %s154_s25 = sshll.u32 %s596_s24, 4  ;;  %s155_s25 = int_to_ptr.vmem [resolvable:$true] %s154_s25 }
   0xe   : > { %s674_s26 = sadd.s32 1, %s594_s18   ;;  %s28_s30 = sadd.s32 1, %s590_s17 }
   0xf   : > { %s843_s23 = scalar_select %p666_p8, 1, 0 }
  0x10   : > { %p415_p10 = pneg %p666_p8  ;;  %s25_s28 = ssub.s32 %s594_s18, %s674_s26 }
  0x11   : > { %p684_p12 = scmp.eq.s32.totalorder %s25_s28, 0  ;;  %s466_s7 = scalar_lea.hbm %s834_s1, 64 }
  0x12   : > { %p678_p11 = pnand %p415_p10, %p838_p1  ;;  %p467_p0 = scmp.ne.s32.totalorder %s834_s1, %s466_s7 }
  0x13   : > { %s845_s29 = scalar_select %p684_p12, 1, 0 }
  0x14   : > { %p468_p3 = pneg %p678_p11  ;;  %p473_p10 = scmp.lt.u32.totalorder %s466_s7, %s834_s1 }
  0x16   : > { %p469_p5 = pnand %p468_p3, %p467_p0 }
  0x18   : > { %p470_p7 = pneg %p469_p5 }
  0x1a   : > { %p475_p9 = pnand %p473_p10, %p470_p7 }
  0x1c   : > { %478 = shalt.err (!%p475_p9)
}
  0x1d   : > { %s479_s12 = scalar_lea.vmem %s155_s25, 64  ;;  %p487_p6 = scmp.lt.s32.totalorder %s155_s25, %s155_s25 }
  0x1e   : > { %p480_p1 = scmp.ne.s32.totalorder %s155_s25, %s479_s12  ;;  %p488_p4 = scmp.lt.s32.totalorder %s479_s12, %s479_s12 }
  0x20   : > { %p482_p2 = pnand %p480_p1, %p468_p3  ;;  %p489_p8 = por %p488_p4, %p487_p6 }
  0x22   : > { %p483_p13 = pneg %p482_p2 }
  0x24   : > { %p490_p12 = pnand %p489_p8, %p483_p13 }
  0x26   : > { %493 = shalt.err (!%p490_p12)
}
  0x27   : > { %418 = dma.hbm_to_vmem [thread:$0]  (!%p678_p11), %s834_s1, 64, %s155_s25, [#allocation6]  }
  0x28   : > { %p846_p1 = scmp.ne.s32.totalorder %s845_s29, 0  ;;  %p36_p2 = scmp.eq.s32.totalorder %s594_s18, 0 }
  0x29   : > { %p847_p4 = scmp.ne.s32.totalorder %s590_s17, %s586_s16  ;;  %p848_p6 = scmp.eq.s32.totalorder %s647_s19, 1 }
  0x2a   : > { %s710_s20 = scalar_select %p846_p1, %s590_s17, %s28_s30  }
  0x2b   : > { %p718_p8 = por %p848_p6, %p847_p4  ;;  %p428_p9 = scmp.lt.s32.totalorder %s594_s18, 2 }
  0x2c   : > { %s171_s27 = sand.u32 1, %s590_s17   ;;  %p850_p12 = pmov %p847_p4 }
  0x2d   : > { %s387_s28 = sshll.u32 %s171_s27, 2  ;;  %s388_s5 = sshll.u32 %s594_s18, 6 }
  0x2e   : > { %p37_p13 = por %p36_p2, %p850_p12  ;;  %s731_s25 = scalar_lea.hbm %s833_s0, %s388_s5 }
  0x2f   : > { %s175_s29 = scalar_lea.vmem [#allocation2], %s387_s28  ;;  %s172_s9 = scalar_lea.sflag [#allocation3], %s171_s27 }
  0x30   : > { %s182_s30 = sshll.u32 %s175_s29, 4  ;;  %p733_p11 = pnand %p428_p9, %p37_p13  ;;  %s737_s30 = int_to_ptr.vmem [resolvable:$true] %s182_s30 }
  0x31   : > { %s494_s10 = scalar_lea.hbm %s731_s25, 64  ;;  %s499_s13 = scalar_lea.hbm %s833_s0, 128 }
  0x32   : > { %p495_p0 = scmp.ne.s32.totalorder %s731_s25, %s494_s10  ;;  %p496_p3 = pneg %p733_p11 }
  0x33   : > { %p500_p10 = scmp.lt.u32.totalorder %s731_s25, %s833_s0  ;;  %p501_p1 = scmp.lt.u32.totalorder %s499_s13, %s494_s10 }
  0x34   : > { %p497_p5 = pnand %p496_p3, %p495_p0  ;;  %p503_p4 = scmp.lt.u32.totalorder %s494_s10, %s731_s25 }
  0x35   : > { %p502_p2 = por %p501_p1, %p500_p10 }
  0x36   : > { %p498_p7 = pneg %p497_p5 }
  0x37   : > { %p504_p6 = por %p503_p4, %p502_p2 }
  0x39   : > { %p505_p9 = pnand %p504_p6, %p498_p7 }
  0x3b   : > { %508 = shalt.err (!%p505_p9)
}
  0x3c   : > { %s509_s27 = scalar_lea.vmem %s737_s30, 64  ;;  %s597_s5 = smov [#allocation2]  }
  0x3d   : > { %p510_p12 = scmp.ne.s32.totalorder %s737_s30, %s509_s27  ;;  %s514_s6 = sshll.u32 %s597_s5, 4  ;;  %s515_s6 = int_to_ptr.vmem [resolvable:$false] %s514_s6 }
  0x3e   : > { %s516_s7 = scalar_lea.vmem %s515_s6, 128  ;;  %p517_p5 = scmp.lt.s32.totalorder %s737_s30, %s515_s6 }
  0x3f   : > { %p512_p13 = pnand %p510_p12, %p496_p3  ;;  %p518_p10 = scmp.lt.s32.totalorder %s516_s7, %s509_s27 }
  0x41   : > { %p513_p0 = pneg %p512_p13  ;;  %p519_p1 = por %p518_p10, %p517_p5 }
  0x43   : > { %p520_p2 = pnand %p519_p1, %p513_p0 }
  0x45   : > { %523 = shalt.err (!%p520_p2)
}
  0x46   : > { %422 = dma.hbm_to_vmem [thread:$0]  (!%p733_p11), %s731_s25, 64, %s737_s30, %s172_s9  }
  0x47   : > { %p852_p7 = scmp.ne.s32.totalorder %s843_s23, 0 }
  0x48   : > { %s767_s29 = sand.u32 (!%p852_p7), 1, %s586_s16   ;;  %p853_p3 = scmp.ne.s32.totalorder (!%p852_p7), %s841_s21, 0 }
  0x49   : > { %191 = sbr.rel (%p852_p7) target bundleno = 321 (0x141), region = 36  ;;  %s390_s10 = sshll.u32 (!%p852_p7), %s767_s29, 2 }
  0x4a   : > { %s194_s11 = scalar_lea.sflag (!%p852_p7), [#allocation3], %s767_s29  ;;  %s197_s12 = scalar_lea.vmem (!%p852_p7), [#allocation2], %s390_s10 }
  0x50   : > { %569 = dma.done.wait (%p853_p3), %s194_s11, 64  }
  0x51   : > { %571 = vsyncadd (%p853_p3), %s194_s11, 4294967232  ;;  %p854_p4 = scmp.eq.s32.totalorder %s647_s19, 0 }
  0x53   : > { %573 = dma.done.wait (%p854_p4), [#allocation6], 64   ;;  %p855_p11 = pmov %p854_p4 }
  0x54   : > { %v598_v0 = vmov 0.0   ;;  %vm599_vm0 = vmmov 0   ;;  %vm241_vm1 = vcmask 1043456   ;;  %v228_v1 = vld [vmem:[#allocation5] sm:$0xf]  ;;  %vm237_vm2 = vcmask 64512  }
  0x55   : > { %575 = vsyncadd (%p855_p11), [#allocation6], 4294967232  ;;  %401 = vmatprep.subr.bf16.mxu0 %v598_v0  ;;  %403 = vmatprep.mubr.msk.bf16.mxu0 %vm599_vm0, %v598_v0  ;;  %v243_v2 = vsel %vm241_vm1, %v228_v1, 0  ;;  %v227_v3 = vld [vmem:[%s197_s12] sm:$0xf]  ;;  %s396_s8 = sshll.u32 %s647_s19, 6 }
  0x56   : > { %402 = vmatpush3.bf16.msra.mxu0 %v243_v2  ;;  %v393_v4 = vld [vmem:[%s835_s2] ss:$0 sm:$0xff]  ;;  %s225_s9 = scalar_lea.vmem [#allocation7], %s390_s10  ;;  %vm287_vm3 = vcmask 257024   ;;  %s789_s27 = scalar_lea.hbm %s837_s4, %s396_s8 }
  0x57   : > { %v230_v5 = vld [vmem:[%s836_s3] sm:$0xff]  ;;  %s303_s13 = sshll.u32 %s225_s9, 4  ;;  %s290_s5 = scalar_lea.sflag [#allocation4], %s767_s29  ;;  %s791_s13 = int_to_ptr.vmem [resolvable:$true] %s303_s13 }
  0x58   : > { %s524_s6 = scalar_lea.vmem %s791_s13, 64  ;;  %s600_s19 = smov [#allocation7]  }
  0x59   : > { %404 = vmatmul.mubr.msk.bf16.vlgmr.msra.gmra.mrb[0].mxu0 %vm237_vm2, %v227_v3  ;;  %p525_p6 = scmp.ne.s32.totalorder %s791_s13, %s524_s6  ;;  %s528_s7 = sshll.u32 %s600_s19, 4  ;;  %s529_s7 = int_to_ptr.vmem [resolvable:$false] %s528_s7 }
  0x5a   : > { %s530_s10 = scalar_lea.vmem %s529_s7, 128  ;;  %p531_p13 = scmp.lt.s32.totalorder %s791_s13, %s529_s7 }
  0x5b   : > { %p526_p9 = pnand %p525_p6, %p718_p8  ;;  %p532_p0 = scmp.lt.s32.totalorder %s530_s10, %s524_s6 }
  0x5d   : > { %p527_p12 = pneg %p526_p9  ;;  %p533_p5 = por %p532_p0, %p531_p13 }
  0x5f   : > { %p534_p10 = pnand %p533_p5, %p527_p12 }
 0x12c   : > { %v279_v6 = vpop.f32.mrb[0].mxu0 }
 0x12d   : > { %v280_v7 = vadd.f32 %v393_v4, %v279_v6  ;;  %v405_v8 = vpop.f32.mrb[1].mxu0 }
 0x12e   : > { %v282_v9 = vpop.f32.mrb[2].mxu0 }
 0x12f   : > { %v285_v10 = vadd.f32 %v280_v7, %v230_v5  ;;  %v406_v11 = vpop.f32.mrb[3].mxu0 }
 0x131   : > { %v286_v12 = vpack.c.bf16 %v285_v10, %v285_v10 }
 0x133   : > { %288 = vst.msk [vmem:[%s225_s9] sm:$0xf] %vm287_vm3, %v286_v12 }
 0x134   : > { %537 = shalt.err (!%p534_p10)
}
 0x135   : > { %s538_s29 = scalar_lea.hbm %s789_s27, 64  ;;  %s542_s21 = scalar_lea.hbm %s837_s4, 128 }
 0x136   : > { %p539_p1 = scmp.ne.s32.totalorder %s789_s27, %s538_s29  ;;  %p543_p3 = scmp.lt.u32.totalorder %s789_s27, %s837_s4 }
 0x137   : > { %p544_p4 = scmp.lt.u32.totalorder %s542_s21, %s538_s29  ;;  %p546_p6 = scmp.lt.u32.totalorder %s538_s29, %s789_s27 }
 0x138   : > { %p540_p2 = pnand %p539_p1, %p718_p8 }
 0x139   : > { %p545_p11 = por %p544_p4, %p543_p3 }
 0x13a   : > { %p541_p7 = pneg %p540_p2 }
 0x13b   : > { %p547_p9 = por %p546_p6, %p545_p11 }
 0x13d   : > { %p548_p12 = pnand %p547_p9, %p541_p7 }
 0x13f   : > { %551 = shalt.err (!%p548_p12)
}
 0x140   : > { %413 = dma.vmem_to_hbm [thread:$0]  (%p718_p8), %s791_s13, 64, %s789_s27, %s290_s5  }
 0x141 PF: > { %s315_s30 = sand.u32 1, %s582_s15   ;;  %p856_p13 = scmp.ne.s32.totalorder %s842_s22, 0 }
 0x142   : > { %p857_p0 = scmp.ge.s32.totalorder %s594_s18, 2  ;;  %s316_s8 = scalar_lea.sflag [#allocation4], %s315_s30 }
 0x144   : > { %p424_p5 = pnand %p857_p0, %p856_p13 }
 0x146   : > { %577 = dma.done.wait (!%p424_p5), %s316_s8, 64  }
 0x147   : > { %579 = vsyncadd (!%p424_p5), %s316_s8, 4294967232  ;;  %p18_p10 = scmp.ge.s32.totalorder %s674_s26, 4   ;;  %s858_s15 = smov %s586_s16 }
 0x148   : > { %s859_s16 = smov %s590_s17  ;;  %s860_s17 = smov %s710_s20 }
 0x149   : > { %s861_s18 = smov %s674_s26  ;;  %20 = sbr.rel (!%p18_p10) target bundleno = 6 (0x6), region = 85 }
 0x150   :  { %321 = vsyncpa [#allocation3], 1 }
 0x151   :  { %323 = vsyncpa [#allocation3 + $0x1], 1 }
 0x152   :  { %324 = vsyncpa [#allocation6], 1 }
 0x153   :  { %325 = vsyncpa [#allocation4], 1 }
 0x154   :  { %327 = vsyncpa [#allocation4 + $0x1], 1 }

</bundles_post_ra>
